<compile_context>
chip_gen: v6e
topology: v6e:2x2x1
jax: 0.10.0
libtpu: 0.0.40
codegen_flags: <defaults>
</compile_context>

<pallas_src>
import functools

import jax
import jax.numpy as jnp
import numpy as np
from jax.experimental import pallas as pl
from jax.experimental.pallas import tpu as pltpu


def _encoder_gru_kernel(tok_ref, len_ref, emb_ref, wihT_ref, whhT_ref,
                        bx_ref, bhn_ref, out_ref, hid_ref,
                        *, batch, seq, hidden):
    """Embedding (one-hot matmul) + fully-unrolled GRU recurrence + length masking."""
    B, S, H = batch, seq, hidden
    V = emb_ref.shape[0]
    SB = S * B

    # ---- embedding: one-hot(tokens) @ embedding_table, whole sequence at once ----
    tok = tok_ref[...]                                             # (S*B, 1) int32
    col = jax.lax.broadcasted_iota(jnp.int32, (SB, V), 1)          # (S*B, V)
    onehot = (col == tok).astype(jnp.float32)                      # (S*B, V)
    xemb = jnp.dot(onehot, emb_ref[...],
                   preferred_element_type=jnp.float32)             # (S*B, E)

    # ---- input-side gate projections for every timestep, with folded biases ----
    # bx = bias_ih (all gates) + bias_hh (r,z gates only); n-gate bias_hh is kept
    # separate because it must live inside r * (W_hn h + b_hn).
    xg_all = (jnp.dot(xemb, wihT_ref[...],
                      preferred_element_type=jnp.float32)
              + bx_ref[...])                                       # (S*B, 3H)

    whhT = whhT_ref[...]                                           # (H, 3H)
    bhn = jnp.broadcast_to(bhn_ref[...], (B, H))                   # hoisted broadcast

    # ---- loop-invariant packed-sequence masks (computed once) ----
    lens = len_ref[...]                                            # (B, 1) int32
    masks = [(t < lens).astype(jnp.float32) for t in range(S)]     # each (B, 1)

    # ---- GRU recurrence, fully unrolled, hidden state carried in registers ----
    h = jnp.zeros((B, H), jnp.float32)
    outs = []
    for t in range(S):
        xg = xg_all[t * B:(t + 1) * B, :]                          # (B, 3H), static slice
        hg = jnp.dot(h, whhT, preferred_element_type=jnp.float32)  # (B, 3H)

        r = jax.nn.sigmoid(xg[:, 0:H] + hg[:, 0:H])
        z = jax.nn.sigmoid(xg[:, H:2 * H] + hg[:, H:2 * H])
        n = jnp.tanh(xg[:, 2 * H:3 * H] + r * (hg[:, 2 * H:3 * H] + bhn))
        h_new = (1.0 - z) * n + z * h

        m = masks[t]
        out_t = m * h_new                                          # zero at padding
        h = out_t + (1.0 - m) * h                                  # freeze past length
        outs.append(out_t)

    # ---- single lane-dense output store: (B, S*H) with S*H a multiple of 128 ----
    out_ref[...] = jnp.concatenate(outs, axis=-1)                  # (B, S*H)
    hid_ref[...] = h                                               # final per-seq hidden


def encoder_forward(x_tokens, x_sz, params, max_len=None):
    """JAX wrapper reproducing Encoder.forward (gru, layers=1, unidirectional).

    `max_len` is a static Python int (pad_packed_sequence pads to the longest
    sequence); if None, the full padded length S is returned.
    """
    B, S = x_tokens.shape
    emb = params["embedding"]                                      # (V, E)
    wih, whh = params["weight_ih"], params["weight_hh"]            # (3H, E), (3H, H)
    bih, bhh = params["bias_ih"], params["bias_hh"]                # (3H,), (3H,)
    H = whh.shape[1]

    tok_tm = jnp.transpose(x_tokens, (1, 0)).reshape(S * B, 1).astype(jnp.int32)
    lens = x_sz.reshape(B, 1).astype(jnp.int32)

    # Fold bias_ih (all gates) + bias_hh (r,z gates) into the input-side bias.
    bias_x = (bih + jnp.concatenate(
        [bhh[:2 * H], jnp.zeros((H,), bhh.dtype)])).reshape(1, 3 * H)
    bias_hn = bhh[2 * H:3 * H].reshape(1, H)

    kernel = functools.partial(_encoder_gru_kernel, batch=B, seq=S, hidden=H)
    vmem = pl.BlockSpec(memory_space=pltpu.MemorySpace.VMEM)

    out_bm, h_final = pl.pallas_call(
        kernel,
        out_shape=(
            jax.ShapeDtypeStruct((B, S * H), jnp.float32),
            jax.ShapeDtypeStruct((B, H), jnp.float32),
        ),
        in_specs=[vmem] * 7,
        out_specs=(vmem, vmem),
    )(
        tok_tm, lens,
        emb.astype(jnp.float32),
        jnp.transpose(wih).astype(jnp.float32),     # (E, 3H)
        jnp.transpose(whh).astype(jnp.float32),     # (H, 3H)
        bias_x.astype(jnp.float32),                 # (1, 3H)
        bias_hn.astype(jnp.float32),                # (1, H)
    )

    output = out_bm.reshape(B, S, H)                # already batch-major (B, S, H)
    if max_len is not None:
        output = output[:, :max_len, :]
    hidden = h_final[None]                          # (1, B, H)
    return output, hidden


def encoder_reference(x_tokens, x_sz, params, max_len=None):
    """Pure-JAX reference (PyTorch GRU + packed-sequence semantics)."""
    emb = params["embedding"]
    wih, whh = params["weight_ih"], params["weight_hh"]
    bih, bhh = params["bias_ih"], params["bias_hh"]
    B, S = x_tokens.shape
    H = whh.shape[1]

    x = emb[x_tokens]                                              # (B, S, E)
    mask = (jnp.arange(S)[None, :] < x_sz[:, None]).astype(jnp.float32)  # (B, S)

    def cell(h, inp):
        x_t, m_t = inp                                             # (B,E), (B,1)
        gi = x_t @ wih.T + bih
        gh = h @ whh.T + bhh
        r = jax.nn.sigmoid(gi[:, :H] + gh[:, :H])
        z = jax.nn.sigmoid(gi[:, H:2 * H] + gh[:, H:2 * H])
        n = jnp.tanh(gi[:, 2 * H:] + r * gh[:, 2 * H:])
        h_new = (1.0 - z) * n + z * h
        h_out = m_t * h_new + (1.0 - m_t) * h
        return h_out, m_t * h_new

    xs = (jnp.transpose(x, (1, 0, 2)), jnp.transpose(mask)[..., None])
    h0 = jnp.zeros((B, H), jnp.float32)
    h_fin, outs = jax.lax.scan(cell, h0, xs)
    out = jnp.transpose(outs, (1, 0, 2))
    if max_len is not None:
        out = out[:, :max_len, :]
    return out, h_fin[None]


def init_params(key, vocab, embed_dim, hidden_dim):
    k = jax.random.split(key, 5)
    s = 1.0 / np.sqrt(hidden_dim)
    return {
        "embedding": jax.random.normal(k[0], (vocab, embed_dim), jnp.float32),
        "weight_ih": jax.random.uniform(k[1], (3 * hidden_dim, embed_dim),
                                        jnp.float32, -s, s),
        "weight_hh": jax.random.uniform(k[2], (3 * hidden_dim, hidden_dim),
                                        jnp.float32, -s, s),
        "bias_ih": jax.random.uniform(k[3], (3 * hidden_dim,), jnp.float32, -s, s),
        "bias_hh": jax.random.uniform(k[4], (3 * hidden_dim,), jnp.float32, -s, s),
    }


if __name__ == "__main__":
    # Encoder(input_dim=16, embed_dim=32, hidden_dim=32, rnn_type='gru',
    #         layers=1, bidirectional=False)
    VOCAB, EMBED, HIDDEN = 16, 32, 32
    BATCH, SEQ = 8, 8

    key = jax.random.PRNGKey(0)
    kp, kx = jax.random.split(key)
    params = init_params(kp, VOCAB, EMBED, HIDDEN)

    x = jax.random.randint(kx, (BATCH, SEQ), 0, VOCAB, dtype=jnp.int32)
    lens_list = [8, 7, 5, 8, 3, 6, 4, 2]                           # unpadded lengths
    x_sz = jnp.array(lens_list, dtype=jnp.int32)
    MAX_LEN = int(max(lens_list))                                  # static, no host sync

    fwd = jax.jit(functools.partial(encoder_forward, max_len=MAX_LEN))
    out, hidden = fwd(x, x_sz, params)
    out = jax.block_until_ready(out)
    hidden = jax.block_until_ready(hidden)

    out_ref, hid_ref = encoder_reference(x, x_sz, params, max_len=MAX_LEN)
    np.testing.assert_allclose(np.asarray(out), np.asarray(out_ref),
                               rtol=1e-5, atol=1e-5)
    np.testing.assert_allclose(np.asarray(hidden), np.asarray(hid_ref),
                               rtol=1e-5, atol=1e-5)

    assert out.shape == (BATCH, MAX_LEN, HIDDEN)
    assert hidden.shape == (1, BATCH, HIDDEN)
    print("KERNEL_OK")
</pallas_src>

<mosaic_0001>
module attributes {stable_mosaic.version = 11 : i64} {
  func.func @_encoder_gru_kernel(%arg0: memref<64x1xi32, #tpu.memory_space<vmem>>, %arg1: memref<8x1xi32, #tpu.memory_space<vmem>>, %arg2: memref<16x32xf32, #tpu.memory_space<vmem>>, %arg3: memref<32x96xf32, #tpu.memory_space<vmem>>, %arg4: memref<32x96xf32, #tpu.memory_space<vmem>>, %arg5: memref<1x96xf32, #tpu.memory_space<vmem>>, %arg6: memref<1x32xf32, #tpu.memory_space<vmem>>, %arg7: memref<8x256xf32, #tpu.memory_space<vmem>>, %arg8: memref<8x32xf32, #tpu.memory_space<vmem>>) attributes {dimension_semantics = [], scalar_prefetch = 0 : i64, scratch_operands = 0 : i64, tpu.core_type = #tpu.core_type<tc>} {
    %c0 = arith.constant 0 : index
    %c0_0 = arith.constant 0 : index
    %0 = vector.load %arg0[%c0, %c0_0] : memref<64x1xi32, #tpu.memory_space<vmem>>, vector<64x1xi32>
    %1 = tpu.iota {dimensions = array<i32: 1>} : vector<64x16xi32>
    %2 = vector.broadcast %0 : vector<64x1xi32> to vector<64x16xi32>
    %3 = arith.cmpi eq, %1, %2 : vector<64x16xi32>
    %4 = arith.extui %3 : vector<64x16xi1> to vector<64x16xi32>
    %5 = arith.sitofp %4 : vector<64x16xi32> to vector<64x16xf32>
    %c0_1 = arith.constant 0 : index
    %c0_2 = arith.constant 0 : index
    %6 = vector.load %arg2[%c0_1, %c0_2] : memref<16x32xf32, #tpu.memory_space<vmem>>, vector<16x32xf32>
    %cst = arith.constant dense<0.000000e+00> : vector<64x32xf32>
    %7 = tpu.matmul %5, %6, %cst {dimension_numbers = #tpu.dot_dimension_numbers<[1], [0], [0], [1], [0, 0, 1, 1], [], []>} : vector<64x16xf32>, vector<16x32xf32>, vector<64x32xf32> -> vector<64x32xf32>
    %c0_3 = arith.constant 0 : index
    %c0_4 = arith.constant 0 : index
    %8 = vector.load %arg3[%c0_3, %c0_4] : memref<32x96xf32, #tpu.memory_space<vmem>>, vector<32x96xf32>
    %cst_5 = arith.constant dense<0.000000e+00> : vector<64x96xf32>
    %9 = tpu.matmul %7, %8, %cst_5 {dimension_numbers = #tpu.dot_dimension_numbers<[1], [0], [0], [1], [0, 0, 1, 1], [], []>} : vector<64x32xf32>, vector<32x96xf32>, vector<64x96xf32> -> vector<64x96xf32>
    %c0_6 = arith.constant 0 : index
    %c0_7 = arith.constant 0 : index
    %10 = vector.load %arg5[%c0_6, %c0_7] : memref<1x96xf32, #tpu.memory_space<vmem>>, vector<1x96xf32>
    %11 = vector.broadcast %10 : vector<1x96xf32> to vector<64x96xf32>
    %12 = arith.addf %9, %11 : vector<64x96xf32>
    %c0_8 = arith.constant 0 : index
    %c0_9 = arith.constant 0 : index
    %13 = vector.load %arg4[%c0_8, %c0_9] : memref<32x96xf32, #tpu.memory_space<vmem>>, vector<32x96xf32>
    %c0_10 = arith.constant 0 : index
    %c0_11 = arith.constant 0 : index
    %14 = vector.load %arg6[%c0_10, %c0_11] : memref<1x32xf32, #tpu.memory_space<vmem>>, vector<1x32xf32>
    %15 = vector.shape_cast %14 : vector<1x32xf32> to vector<1x32xf32>
    %16 = vector.broadcast %15 : vector<1x32xf32> to vector<8x32xf32>
    %c0_12 = arith.constant 0 : index
    %c0_13 = arith.constant 0 : index
    %17 = vector.load %arg1[%c0_12, %c0_13] : memref<8x1xi32, #tpu.memory_space<vmem>>, vector<8x1xi32>
    %c0_i32 = arith.constant 0 : i32
    %18 = vector.broadcast %c0_i32 : i32 to vector<8x1xi32>
    %19 = arith.cmpi sgt, %17, %18 : vector<8x1xi32>
    %20 = arith.extui %19 : vector<8x1xi1> to vector<8x1xi32>
    %21 = arith.sitofp %20 : vector<8x1xi32> to vector<8x1xf32>
    %c1_i32 = arith.constant 1 : i32
    %22 = vector.broadcast %c1_i32 : i32 to vector<8x1xi32>
    %23 = arith.cmpi sgt, %17, %22 : vector<8x1xi32>
    %24 = arith.extui %23 : vector<8x1xi1> to vector<8x1xi32>
    %25 = arith.sitofp %24 : vector<8x1xi32> to vector<8x1xf32>
    %c2_i32 = arith.constant 2 : i32
    %26 = vector.broadcast %c2_i32 : i32 to vector<8x1xi32>
    %27 = arith.cmpi sgt, %17, %26 : vector<8x1xi32>
    %28 = arith.extui %27 : vector<8x1xi1> to vector<8x1xi32>
    %29 = arith.sitofp %28 : vector<8x1xi32> to vector<8x1xf32>
    %c3_i32 = arith.constant 3 : i32
    %30 = vector.broadcast %c3_i32 : i32 to vector<8x1xi32>
    %31 = arith.cmpi sgt, %17, %30 : vector<8x1xi32>
    %32 = arith.extui %31 : vector<8x1xi1> to vector<8x1xi32>
    %33 = arith.sitofp %32 : vector<8x1xi32> to vector<8x1xf32>
    %c4_i32 = arith.constant 4 : i32
    %34 = vector.broadcast %c4_i32 : i32 to vector<8x1xi32>
    %35 = arith.cmpi sgt, %17, %34 : vector<8x1xi32>
    %36 = arith.extui %35 : vector<8x1xi1> to vector<8x1xi32>
    %37 = arith.sitofp %36 : vector<8x1xi32> to vector<8x1xf32>
    %c5_i32 = arith.constant 5 : i32
    %38 = vector.broadcast %c5_i32 : i32 to vector<8x1xi32>
    %39 = arith.cmpi sgt, %17, %38 : vector<8x1xi32>
    %40 = arith.extui %39 : vector<8x1xi1> to vector<8x1xi32>
    %41 = arith.sitofp %40 : vector<8x1xi32> to vector<8x1xf32>
    %c6_i32 = arith.constant 6 : i32
    %42 = vector.broadcast %c6_i32 : i32 to vector<8x1xi32>
    %43 = arith.cmpi sgt, %17, %42 : vector<8x1xi32>
    %44 = arith.extui %43 : vector<8x1xi1> to vector<8x1xi32>
    %45 = arith.sitofp %44 : vector<8x1xi32> to vector<8x1xf32>
    %c7_i32 = arith.constant 7 : i32
    %46 = vector.broadcast %c7_i32 : i32 to vector<8x1xi32>
    %47 = arith.cmpi sgt, %17, %46 : vector<8x1xi32>
    %48 = arith.extui %47 : vector<8x1xi1> to vector<8x1xi32>
    %49 = arith.sitofp %48 : vector<8x1xi32> to vector<8x1xf32>
    %cst_14 = arith.constant 0.000000e+00 : f32
    %50 = vector.broadcast %cst_14 : f32 to vector<8x32xf32>
    %51 = vector.extract_strided_slice %12 {offsets = [0, 0], sizes = [8, 96], strides = [1, 1]} : vector<64x96xf32> to vector<8x96xf32>
    %cst_15 = arith.constant dense<0.000000e+00> : vector<8x96xf32>
    %52 = tpu.matmul %50, %13, %cst_15 {dimension_numbers = #tpu.dot_dimension_numbers<[1], [0], [0], [1], [0, 0, 1, 1], [], []>} : vector<8x32xf32>, vector<32x96xf32>, vector<8x96xf32> -> vector<8x96xf32>
    %53 = vector.extract_strided_slice %51 {offsets = [0, 0], sizes = [8, 32], strides = [1, 1]} : vector<8x96xf32> to vector<8x32xf32>
    %54 = vector.extract_strided_slice %52 {offsets = [0, 0], sizes = [8, 32], strides = [1, 1]} : vector<8x96xf32> to vector<8x32xf32>
    %55 = arith.addf %53, %54 : vector<8x32xf32>
    %56 = arith.negf %55 : vector<8x32xf32>
    %57 = math.exp %56 : vector<8x32xf32>
    %cst_16 = arith.constant 1.000000e+00 : f32
    %58 = vector.broadcast %cst_16 : f32 to vector<8x32xf32>
    %59 = arith.addf %58, %57 : vector<8x32xf32>
    %60 = arith.divf %58, %59 : vector<8x32xf32>
    %61 = vector.extract_strided_slice %51 {offsets = [0, 32], sizes = [8, 32], strides = [1, 1]} : vector<8x96xf32> to vector<8x32xf32>
    %62 = vector.extract_strided_slice %52 {offsets = [0, 32], sizes = [8, 32], strides = [1, 1]} : vector<8x96xf32> to vector<8x32xf32>
    %63 = arith.addf %61, %62 : vector<8x32xf32>
    %64 = arith.negf %63 : vector<8x32xf32>
    %65 = math.exp %64 : vector<8x32xf32>
    %cst_17 = arith.constant 1.000000e+00 : f32
    %66 = vector.broadcast %cst_17 : f32 to vector<8x32xf32>
    %67 = arith.addf %66, %65 : vector<8x32xf32>
    %68 = arith.divf %66, %67 : vector<8x32xf32>
    %69 = vector.extract_strided_slice %51 {offsets = [0, 64], sizes = [8, 32], strides = [1, 1]} : vector<8x96xf32> to vector<8x32xf32>
    %70 = vector.extract_strided_slice %52 {offsets = [0, 64], sizes = [8, 32], strides = [1, 1]} : vector<8x96xf32> to vector<8x32xf32>
    %71 = arith.addf %70, %16 : vector<8x32xf32>
    %72 = arith.mulf %60, %71 : vector<8x32xf32>
    %73 = arith.addf %69, %72 : vector<8x32xf32>
    %74 = math.tanh %73 : vector<8x32xf32>
    %cst_18 = arith.constant 1.000000e+00 : f32
    %75 = vector.broadcast %cst_18 : f32 to vector<8x32xf32>
    %76 = arith.subf %75, %68 : vector<8x32xf32>
    %77 = arith.mulf %76, %74 : vector<8x32xf32>
    %78 = arith.mulf %68, %50 : vector<8x32xf32>
    %79 = arith.addf %77, %78 : vector<8x32xf32>
    %80 = vector.broadcast %21 : vector<8x1xf32> to vector<8x32xf32>
    %81 = arith.mulf %80, %79 : vector<8x32xf32>
    %cst_19 = arith.constant 1.000000e+00 : f32
    %82 = vector.broadcast %cst_19 : f32 to vector<8x1xf32>
    %83 = arith.subf %82, %21 : vector<8x1xf32>
    %84 = vector.broadcast %83 : vector<8x1xf32> to vector<8x32xf32>
    %85 = arith.mulf %84, %50 : vector<8x32xf32>
    %86 = arith.addf %81, %85 : vector<8x32xf32>
    %87 = vector.extract_strided_slice %12 {offsets = [8, 0], sizes = [8, 96], strides = [1, 1]} : vector<64x96xf32> to vector<8x96xf32>
    %cst_20 = arith.constant dense<0.000000e+00> : vector<8x96xf32>
    %88 = tpu.matmul %86, %13, %cst_20 {dimension_numbers = #tpu.dot_dimension_numbers<[1], [0], [0], [1], [0, 0, 1, 1], [], []>} : vector<8x32xf32>, vector<32x96xf32>, vector<8x96xf32> -> vector<8x96xf32>
    %89 = vector.extract_strided_slice %87 {offsets = [0, 0], sizes = [8, 32], strides = [1, 1]} : vector<8x96xf32> to vector<8x32xf32>
    %90 = vector.extract_strided_slice %88 {offsets = [0, 0], sizes = [8, 32], strides = [1, 1]} : vector<8x96xf32> to vector<8x32xf32>
    %91 = arith.addf %89, %90 : vector<8x32xf32>
    %92 = arith.negf %91 : vector<8x32xf32>
    %93 = math.exp %92 : vector<8x32xf32>
    %cst_21 = arith.constant 1.000000e+00 : f32
    %94 = vector.broadcast %cst_21 : f32 to vector<8x32xf32>
    %95 = arith.addf %94, %93 : vector<8x32xf32>
    %96 = arith.divf %94, %95 : vector<8x32xf32>
    %97 = vector.extract_strided_slice %87 {offsets = [0, 32], sizes = [8, 32], strides = [1, 1]} : vector<8x96xf32> to vector<8x32xf32>
    %98 = vector.extract_strided_slice %88 {offsets = [0, 32], sizes = [8, 32], strides = [1, 1]} : vector<8x96xf32> to vector<8x32xf32>
    %99 = arith.addf %97, %98 : vector<8x32xf32>
    %100 = arith.negf %99 : vector<8x32xf32>
    %101 = math.exp %100 : vector<8x32xf32>
    %cst_22 = arith.constant 1.000000e+00 : f32
    %102 = vector.broadcast %cst_22 : f32 to vector<8x32xf32>
    %103 = arith.addf %102, %101 : vector<8x32xf32>
    %104 = arith.divf %102, %103 : vector<8x32xf32>
    %105 = vector.extract_strided_slice %87 {offsets = [0, 64], sizes = [8, 32], strides = [1, 1]} : vector<8x96xf32> to vector<8x32xf32>
    %106 = vector.extract_strided_slice %88 {offsets = [0, 64], sizes = [8, 32], strides = [1, 1]} : vector<8x96xf32> to vector<8x32xf32>
    %107 = arith.addf %106, %16 : vector<8x32xf32>
    %108 = arith.mulf %96, %107 : vector<8x32xf32>
    %109 = arith.addf %105, %108 : vector<8x32xf32>
    %110 = math.tanh %109 : vector<8x32xf32>
    %cst_23 = arith.constant 1.000000e+00 : f32
    %111 = vector.broadcast %cst_23 : f32 to vector<8x32xf32>
    %112 = arith.subf %111, %104 : vector<8x32xf32>
    %113 = arith.mulf %112, %110 : vector<8x32xf32>
    %114 = arith.mulf %104, %86 : vector<8x32xf32>
    %115 = arith.addf %113, %114 : vector<8x32xf32>
    %116 = vector.broadcast %25 : vector<8x1xf32> to vector<8x32xf32>
    %117 = arith.mulf %116, %115 : vector<8x32xf32>
    %cst_24 = arith.constant 1.000000e+00 : f32
    %118 = vector.broadcast %cst_24 : f32 to vector<8x1xf32>
    %119 = arith.subf %118, %25 : vector<8x1xf32>
    %120 = vector.broadcast %119 : vector<8x1xf32> to vector<8x32xf32>
    %121 = arith.mulf %120, %86 : vector<8x32xf32>
    %122 = arith.addf %117, %121 : vector<8x32xf32>
    %123 = vector.extract_strided_slice %12 {offsets = [16, 0], sizes = [8, 96], strides = [1, 1]} : vector<64x96xf32> to vector<8x96xf32>
    %cst_25 = arith.constant dense<0.000000e+00> : vector<8x96xf32>
    %124 = tpu.matmul %122, %13, %cst_25 {dimension_numbers = #tpu.dot_dimension_numbers<[1], [0], [0], [1], [0, 0, 1, 1], [], []>} : vector<8x32xf32>, vector<32x96xf32>, vector<8x96xf32> -> vector<8x96xf32>
    %125 = vector.extract_strided_slice %123 {offsets = [0, 0], sizes = [8, 32], strides = [1, 1]} : vector<8x96xf32> to vector<8x32xf32>
    %126 = vector.extract_strided_slice %124 {offsets = [0, 0], sizes = [8, 32], strides = [1, 1]} : vector<8x96xf32> to vector<8x32xf32>
    %127 = arith.addf %125, %126 : vector<8x32xf32>
    %128 = arith.negf %127 : vector<8x32xf32>
    %129 = math.exp %128 : vector<8x32xf32>
    %cst_26 = arith.constant 1.000000e+00 : f32
    %130 = vector.broadcast %cst_26 : f32 to vector<8x32xf32>
    %131 = arith.addf %130, %129 : vector<8x32xf32>
    %132 = arith.divf %130, %131 : vector<8x32xf32>
    %133 = vector.extract_strided_slice %123 {offsets = [0, 32], sizes = [8, 32], strides = [1, 1]} : vector<8x96xf32> to vector<8x32xf32>
    %134 = vector.extract_strided_slice %124 {offsets = [0, 32], sizes = [8, 32], strides = [1, 1]} : vector<8x96xf32> to vector<8x32xf32>
    %135 = arith.addf %133, %134 : vector<8x32xf32>
    %136 = arith.negf %135 : vector<8x32xf32>
    %137 = math.exp %136 : vector<8x32xf32>
    %cst_27 = arith.constant 1.000000e+00 : f32
    %138 = vector.broadcast %cst_27 : f32 to vector<8x32xf32>
    %139 = arith.addf %138, %137 : vector<8x32xf32>
    %140 = arith.divf %138, %139 : vector<8x32xf32>
    %141 = vector.extract_strided_slice %123 {offsets = [0, 64], sizes = [8, 32], strides = [1, 1]} : vector<8x96xf32> to vector<8x32xf32>
    %142 = vector.extract_strided_slice %124 {offsets = [0, 64], sizes = [8, 32], strides = [1, 1]} : vector<8x96xf32> to vector<8x32xf32>
    %143 = arith.addf %142, %16 : vector<8x32xf32>
    %144 = arith.mulf %132, %143 : vector<8x32xf32>
    %145 = arith.addf %141, %144 : vector<8x32xf32>
    %146 = math.tanh %145 : vector<8x32xf32>
    %cst_28 = arith.constant 1.000000e+00 : f32
    %147 = vector.broadcast %cst_28 : f32 to vector<8x32xf32>
    %148 = arith.subf %147, %140 : vector<8x32xf32>
    %149 = arith.mulf %148, %146 : vector<8x32xf32>
    %150 = arith.mulf %140, %122 : vector<8x32xf32>
    %151 = arith.addf %149, %150 : vector<8x32xf32>
    %152 = vector.broadcast %29 : vector<8x1xf32> to vector<8x32xf32>
    %153 = arith.mulf %152, %151 : vector<8x32xf32>
    %cst_29 = arith.constant 1.000000e+00 : f32
    %154 = vector.broadcast %cst_29 : f32 to vector<8x1xf32>
    %155 = arith.subf %154, %29 : vector<8x1xf32>
    %156 = vector.broadcast %155 : vector<8x1xf32> to vector<8x32xf32>
    %157 = arith.mulf %156, %122 : vector<8x32xf32>
    %158 = arith.addf %153, %157 : vector<8x32xf32>
    %159 = vector.extract_strided_slice %12 {offsets = [24, 0], sizes = [8, 96], strides = [1, 1]} : vector<64x96xf32> to vector<8x96xf32>
    %cst_30 = arith.constant dense<0.000000e+00> : vector<8x96xf32>
    %160 = tpu.matmul %158, %13, %cst_30 {dimension_numbers = #tpu.dot_dimension_numbers<[1], [0], [0], [1], [0, 0, 1, 1], [], []>} : vector<8x32xf32>, vector<32x96xf32>, vector<8x96xf32> -> vector<8x96xf32>
    %161 = vector.extract_strided_slice %159 {offsets = [0, 0], sizes = [8, 32], strides = [1, 1]} : vector<8x96xf32> to vector<8x32xf32>
    %162 = vector.extract_strided_slice %160 {offsets = [0, 0], sizes = [8, 32], strides = [1, 1]} : vector<8x96xf32> to vector<8x32xf32>
    %163 = arith.addf %161, %162 : vector<8x32xf32>
    %164 = arith.negf %163 : vector<8x32xf32>
    %165 = math.exp %164 : vector<8x32xf32>
    %cst_31 = arith.constant 1.000000e+00 : f32
    %166 = vector.broadcast %cst_31 : f32 to vector<8x32xf32>
    %167 = arith.addf %166, %165 : vector<8x32xf32>
    %168 = arith.divf %166, %167 : vector<8x32xf32>
    %169 = vector.extract_strided_slice %159 {offsets = [0, 32], sizes = [8, 32], strides = [1, 1]} : vector<8x96xf32> to vector<8x32xf32>
    %170 = vector.extract_strided_slice %160 {offsets = [0, 32], sizes = [8, 32], strides = [1, 1]} : vector<8x96xf32> to vector<8x32xf32>
    %171 = arith.addf %169, %170 : vector<8x32xf32>
    %172 = arith.negf %171 : vector<8x32xf32>
    %173 = math.exp %172 : vector<8x32xf32>
    %cst_32 = arith.constant 1.000000e+00 : f32
    %174 = vector.broadcast %cst_32 : f32 to vector<8x32xf32>
    %175 = arith.addf %174, %173 : vector<8x32xf32>
    %176 = arith.divf %174, %175 : vector<8x32xf32>
    %177 = vector.extract_strided_slice %159 {offsets = [0, 64], sizes = [8, 32], strides = [1, 1]} : vector<8x96xf32> to vector<8x32xf32>
    %178 = vector.extract_strided_slice %160 {offsets = [0, 64], sizes = [8, 32], strides = [1, 1]} : vector<8x96xf32> to vector<8x32xf32>
    %179 = arith.addf %178, %16 : vector<8x32xf32>
    %180 = arith.mulf %168, %179 : vector<8x32xf32>
    %181 = arith.addf %177, %180 : vector<8x32xf32>
    %182 = math.tanh %181 : vector<8x32xf32>
    %cst_33 = arith.constant 1.000000e+00 : f32
    %183 = vector.broadcast %cst_33 : f32 to vector<8x32xf32>
    %184 = arith.subf %183, %176 : vector<8x32xf32>
    %185 = arith.mulf %184, %182 : vector<8x32xf32>
    %186 = arith.mulf %176, %158 : vector<8x32xf32>
    %187 = arith.addf %185, %186 : vector<8x32xf32>
    %188 = vector.broadcast %33 : vector<8x1xf32> to vector<8x32xf32>
    %189 = arith.mulf %188, %187 : vector<8x32xf32>
    %cst_34 = arith.constant 1.000000e+00 : f32
    %190 = vector.broadcast %cst_34 : f32 to vector<8x1xf32>
    %191 = arith.subf %190, %33 : vector<8x1xf32>
    %192 = vector.broadcast %191 : vector<8x1xf32> to vector<8x32xf32>
    %193 = arith.mulf %192, %158 : vector<8x32xf32>
    %194 = arith.addf %189, %193 : vector<8x32xf32>
    %195 = vector.extract_strided_slice %12 {offsets = [32, 0], sizes = [8, 96], strides = [1, 1]} : vector<64x96xf32> to vector<8x96xf32>
    %cst_35 = arith.constant dense<0.000000e+00> : vector<8x96xf32>
    %196 = tpu.matmul %194, %13, %cst_35 {dimension_numbers = #tpu.dot_dimension_numbers<[1], [0], [0], [1], [0, 0, 1, 1], [], []>} : vector<8x32xf32>, vector<32x96xf32>, vector<8x96xf32> -> vector<8x96xf32>
    %197 = vector.extract_strided_slice %195 {offsets = [0, 0], sizes = [8, 32], strides = [1, 1]} : vector<8x96xf32> to vector<8x32xf32>
    %198 = vector.extract_strided_slice %196 {offsets = [0, 0], sizes = [8, 32], strides = [1, 1]} : vector<8x96xf32> to vector<8x32xf32>
    %199 = arith.addf %197, %198 : vector<8x32xf32>
    %200 = arith.negf %199 : vector<8x32xf32>
    %201 = math.exp %200 : vector<8x32xf32>
    %cst_36 = arith.constant 1.000000e+00 : f32
    %202 = vector.broadcast %cst_36 : f32 to vector<8x32xf32>
    %203 = arith.addf %202, %201 : vector<8x32xf32>
    %204 = arith.divf %202, %203 : vector<8x32xf32>
    %205 = vector.extract_strided_slice %195 {offsets = [0, 32], sizes = [8, 32], strides = [1, 1]} : vector<8x96xf32> to vector<8x32xf32>
    %206 = vector.extract_strided_slice %196 {offsets = [0, 32], sizes = [8, 32], strides = [1, 1]} : vector<8x96xf32> to vector<8x32xf32>
    %207 = arith.addf %205, %206 : vector<8x32xf32>
    %208 = arith.negf %207 : vector<8x32xf32>
    %209 = math.exp %208 : vector<8x32xf32>
    %cst_37 = arith.constant 1.000000e+00 : f32
    %210 = vector.broadcast %cst_37 : f32 to vector<8x32xf32>
    %211 = arith.addf %210, %209 : vector<8x32xf32>
    %212 = arith.divf %210, %211 : vector<8x32xf32>
    %213 = vector.extract_strided_slice %195 {offsets = [0, 64], sizes = [8, 32], strides = [1, 1]} : vector<8x96xf32> to vector<8x32xf32>
    %214 = vector.extract_strided_slice %196 {offsets = [0, 64], sizes = [8, 32], strides = [1, 1]} : vector<8x96xf32> to vector<8x32xf32>
    %215 = arith.addf %214, %16 : vector<8x32xf32>
    %216 = arith.mulf %204, %215 : vector<8x32xf32>
    %217 = arith.addf %213, %216 : vector<8x32xf32>
    %218 = math.tanh %217 : vector<8x32xf32>
    %cst_38 = arith.constant 1.000000e+00 : f32
    %219 = vector.broadcast %cst_38 : f32 to vector<8x32xf32>
    %220 = arith.subf %219, %212 : vector<8x32xf32>
    %221 = arith.mulf %220, %218 : vector<8x32xf32>
    %222 = arith.mulf %212, %194 : vector<8x32xf32>
    %223 = arith.addf %221, %222 : vector<8x32xf32>
    %224 = vector.broadcast %37 : vector<8x1xf32> to vector<8x32xf32>
    %225 = arith.mulf %224, %223 : vector<8x32xf32>
    %cst_39 = arith.constant 1.000000e+00 : f32
    %226 = vector.broadcast %cst_39 : f32 to vector<8x1xf32>
    %227 = arith.subf %226, %37 : vector<8x1xf32>
    %228 = vector.broadcast %227 : vector<8x1xf32> to vector<8x32xf32>
    %229 = arith.mulf %228, %194 : vector<8x32xf32>
    %230 = arith.addf %225, %229 : vector<8x32xf32>
    %231 = vector.extract_strided_slice %12 {offsets = [40, 0], sizes = [8, 96], strides = [1, 1]} : vector<64x96xf32> to vector<8x96xf32>
    %cst_40 = arith.constant dense<0.000000e+00> : vector<8x96xf32>
    %232 = tpu.matmul %230, %13, %cst_40 {dimension_numbers = #tpu.dot_dimension_numbers<[1], [0], [0], [1], [0, 0, 1, 1], [], []>} : vector<8x32xf32>, vector<32x96xf32>, vector<8x96xf32> -> vector<8x96xf32>
    %233 = vector.extract_strided_slice %231 {offsets = [0, 0], sizes = [8, 32], strides = [1, 1]} : vector<8x96xf32> to vector<8x32xf32>
    %234 = vector.extract_strided_slice %232 {offsets = [0, 0], sizes = [8, 32], strides = [1, 1]} : vector<8x96xf32> to vector<8x32xf32>
    %235 = arith.addf %233, %234 : vector<8x32xf32>
    %236 = arith.negf %235 : vector<8x32xf32>
    %237 = math.exp %236 : vector<8x32xf32>
    %cst_41 = arith.constant 1.000000e+00 : f32
    %238 = vector.broadcast %cst_41 : f32 to vector<8x32xf32>
    %239 = arith.addf %238, %237 : vector<8x32xf32>
    %240 = arith.divf %238, %239 : vector<8x32xf32>
    %241 = vector.extract_strided_slice %231 {offsets = [0, 32], sizes = [8, 32], strides = [1, 1]} : vector<8x96xf32> to vector<8x32xf32>
    %242 = vector.extract_strided_slice %232 {offsets = [0, 32], sizes = [8, 32], strides = [1, 1]} : vector<8x96xf32> to vector<8x32xf32>
    %243 = arith.addf %241, %242 : vector<8x32xf32>
    %244 = arith.negf %243 : vector<8x32xf32>
    %245 = math.exp %244 : vector<8x32xf32>
    %cst_42 = arith.constant 1.000000e+00 : f32
    %246 = vector.broadcast %cst_42 : f32 to vector<8x32xf32>
    %247 = arith.addf %246, %245 : vector<8x32xf32>
    %248 = arith.divf %246, %247 : vector<8x32xf32>
    %249 = vector.extract_strided_slice %231 {offsets = [0, 64], sizes = [8, 32], strides = [1, 1]} : vector<8x96xf32> to vector<8x32xf32>
    %250 = vector.extract_strided_slice %232 {offsets = [0, 64], sizes = [8, 32], strides = [1, 1]} : vector<8x96xf32> to vector<8x32xf32>
    %251 = arith.addf %250, %16 : vector<8x32xf32>
    %252 = arith.mulf %240, %251 : vector<8x32xf32>
    %253 = arith.addf %249, %252 : vector<8x32xf32>
    %254 = math.tanh %253 : vector<8x32xf32>
    %cst_43 = arith.constant 1.000000e+00 : f32
    %255 = vector.broadcast %cst_43 : f32 to vector<8x32xf32>
    %256 = arith.subf %255, %248 : vector<8x32xf32>
    %257 = arith.mulf %256, %254 : vector<8x32xf32>
    %258 = arith.mulf %248, %230 : vector<8x32xf32>
    %259 = arith.addf %257, %258 : vector<8x32xf32>
    %260 = vector.broadcast %41 : vector<8x1xf32> to vector<8x32xf32>
    %261 = arith.mulf %260, %259 : vector<8x32xf32>
    %cst_44 = arith.constant 1.000000e+00 : f32
    %262 = vector.broadcast %cst_44 : f32 to vector<8x1xf32>
    %263 = arith.subf %262, %41 : vector<8x1xf32>
    %264 = vector.broadcast %263 : vector<8x1xf32> to vector<8x32xf32>
    %265 = arith.mulf %264, %230 : vector<8x32xf32>
    %266 = arith.addf %261, %265 : vector<8x32xf32>
    %267 = vector.extract_strided_slice %12 {offsets = [48, 0], sizes = [8, 96], strides = [1, 1]} : vector<64x96xf32> to vector<8x96xf32>
    %cst_45 = arith.constant dense<0.000000e+00> : vector<8x96xf32>
    %268 = tpu.matmul %266, %13, %cst_45 {dimension_numbers = #tpu.dot_dimension_numbers<[1], [0], [0], [1], [0, 0, 1, 1], [], []>} : vector<8x32xf32>, vector<32x96xf32>, vector<8x96xf32> -> vector<8x96xf32>
    %269 = vector.extract_strided_slice %267 {offsets = [0, 0], sizes = [8, 32], strides = [1, 1]} : vector<8x96xf32> to vector<8x32xf32>
    %270 = vector.extract_strided_slice %268 {offsets = [0, 0], sizes = [8, 32], strides = [1, 1]} : vector<8x96xf32> to vector<8x32xf32>
    %271 = arith.addf %269, %270 : vector<8x32xf32>
    %272 = arith.negf %271 : vector<8x32xf32>
    %273 = math.exp %272 : vector<8x32xf32>
    %cst_46 = arith.constant 1.000000e+00 : f32
    %274 = vector.broadcast %cst_46 : f32 to vector<8x32xf32>
    %275 = arith.addf %274, %273 : vector<8x32xf32>
    %276 = arith.divf %274, %275 : vector<8x32xf32>
    %277 = vector.extract_strided_slice %267 {offsets = [0, 32], sizes = [8, 32], strides = [1, 1]} : vector<8x96xf32> to vector<8x32xf32>
    %278 = vector.extract_strided_slice %268 {offsets = [0, 32], sizes = [8, 32], strides = [1, 1]} : vector<8x96xf32> to vector<8x32xf32>
    %279 = arith.addf %277, %278 : vector<8x32xf32>
    %280 = arith.negf %279 : vector<8x32xf32>
    %281 = math.exp %280 : vector<8x32xf32>
    %cst_47 = arith.constant 1.000000e+00 : f32
    %282 = vector.broadcast %cst_47 : f32 to vector<8x32xf32>
    %283 = arith.addf %282, %281 : vector<8x32xf32>
    %284 = arith.divf %282, %283 : vector<8x32xf32>
    %285 = vector.extract_strided_slice %267 {offsets = [0, 64], sizes = [8, 32], strides = [1, 1]} : vector<8x96xf32> to vector<8x32xf32>
    %286 = vector.extract_strided_slice %268 {offsets = [0, 64], sizes = [8, 32], strides = [1, 1]} : vector<8x96xf32> to vector<8x32xf32>
    %287 = arith.addf %286, %16 : vector<8x32xf32>
    %288 = arith.mulf %276, %287 : vector<8x32xf32>
    %289 = arith.addf %285, %288 : vector<8x32xf32>
    %290 = math.tanh %289 : vector<8x32xf32>
    %cst_48 = arith.constant 1.000000e+00 : f32
    %291 = vector.broadcast %cst_48 : f32 to vector<8x32xf32>
    %292 = arith.subf %291, %284 : vector<8x32xf32>
    %293 = arith.mulf %292, %290 : vector<8x32xf32>
    %294 = arith.mulf %284, %266 : vector<8x32xf32>
    %295 = arith.addf %293, %294 : vector<8x32xf32>
    %296 = vector.broadcast %45 : vector<8x1xf32> to vector<8x32xf32>
    %297 = arith.mulf %296, %295 : vector<8x32xf32>
    %cst_49 = arith.constant 1.000000e+00 : f32
    %298 = vector.broadcast %cst_49 : f32 to vector<8x1xf32>
    %299 = arith.subf %298, %45 : vector<8x1xf32>
    %300 = vector.broadcast %299 : vector<8x1xf32> to vector<8x32xf32>
    %301 = arith.mulf %300, %266 : vector<8x32xf32>
    %302 = arith.addf %297, %301 : vector<8x32xf32>
    %303 = vector.extract_strided_slice %12 {offsets = [56, 0], sizes = [8, 96], strides = [1, 1]} : vector<64x96xf32> to vector<8x96xf32>
    %cst_50 = arith.constant dense<0.000000e+00> : vector<8x96xf32>
    %304 = tpu.matmul %302, %13, %cst_50 {dimension_numbers = #tpu.dot_dimension_numbers<[1], [0], [0], [1], [0, 0, 1, 1], [], []>} : vector<8x32xf32>, vector<32x96xf32>, vector<8x96xf32> -> vector<8x96xf32>
    %305 = vector.extract_strided_slice %303 {offsets = [0, 0], sizes = [8, 32], strides = [1, 1]} : vector<8x96xf32> to vector<8x32xf32>
    %306 = vector.extract_strided_slice %304 {offsets = [0, 0], sizes = [8, 32], strides = [1, 1]} : vector<8x96xf32> to vector<8x32xf32>
    %307 = arith.addf %305, %306 : vector<8x32xf32>
    %308 = arith.negf %307 : vector<8x32xf32>
    %309 = math.exp %308 : vector<8x32xf32>
    %cst_51 = arith.constant 1.000000e+00 : f32
    %310 = vector.broadcast %cst_51 : f32 to vector<8x32xf32>
    %311 = arith.addf %310, %309 : vector<8x32xf32>
    %312 = arith.divf %310, %311 : vector<8x32xf32>
    %313 = vector.extract_strided_slice %303 {offsets = [0, 32], sizes = [8, 32], strides = [1, 1]} : vector<8x96xf32> to vector<8x32xf32>
    %314 = vector.extract_strided_slice %304 {offsets = [0, 32], sizes = [8, 32], strides = [1, 1]} : vector<8x96xf32> to vector<8x32xf32>
    %315 = arith.addf %313, %314 : vector<8x32xf32>
    %316 = arith.negf %315 : vector<8x32xf32>
    %317 = math.exp %316 : vector<8x32xf32>
    %cst_52 = arith.constant 1.000000e+00 : f32
    %318 = vector.broadcast %cst_52 : f32 to vector<8x32xf32>
    %319 = arith.addf %318, %317 : vector<8x32xf32>
    %320 = arith.divf %318, %319 : vector<8x32xf32>
    %321 = vector.extract_strided_slice %303 {offsets = [0, 64], sizes = [8, 32], strides = [1, 1]} : vector<8x96xf32> to vector<8x32xf32>
    %322 = vector.extract_strided_slice %304 {offsets = [0, 64], sizes = [8, 32], strides = [1, 1]} : vector<8x96xf32> to vector<8x32xf32>
    %323 = arith.addf %322, %16 : vector<8x32xf32>
    %324 = arith.mulf %312, %323 : vector<8x32xf32>
    %325 = arith.addf %321, %324 : vector<8x32xf32>
    %326 = math.tanh %325 : vector<8x32xf32>
    %cst_53 = arith.constant 1.000000e+00 : f32
    %327 = vector.broadcast %cst_53 : f32 to vector<8x32xf32>
    %328 = arith.subf %327, %320 : vector<8x32xf32>
    %329 = arith.mulf %328, %326 : vector<8x32xf32>
    %330 = arith.mulf %320, %302 : vector<8x32xf32>
    %331 = arith.addf %329, %330 : vector<8x32xf32>
    %332 = vector.broadcast %49 : vector<8x1xf32> to vector<8x32xf32>
    %333 = arith.mulf %332, %331 : vector<8x32xf32>
    %cst_54 = arith.constant 1.000000e+00 : f32
    %334 = vector.broadcast %cst_54 : f32 to vector<8x1xf32>
    %335 = arith.subf %334, %49 : vector<8x1xf32>
    %336 = vector.broadcast %335 : vector<8x1xf32> to vector<8x32xf32>
    %337 = arith.mulf %336, %302 : vector<8x32xf32>
    %338 = arith.addf %333, %337 : vector<8x32xf32>
    %339 = tpu.concatenate %81, %117, %153, %189, %225, %261, %297, %333 in 1 : vector<8x32xf32>, vector<8x32xf32>, vector<8x32xf32>, vector<8x32xf32>, vector<8x32xf32>, vector<8x32xf32>, vector<8x32xf32>, vector<8x32xf32> -> vector<8x256xf32>
    %c0_55 = arith.constant 0 : index
    %c0_56 = arith.constant 0 : index
    %340 = vector.load %arg7[%c0_55, %c0_56] : memref<8x256xf32, #tpu.memory_space<vmem>>, vector<8x256xf32>
    tpu.vector_store %arg7[%c0_55, %c0_56], %339 {strides = array<i32>} : memref<8x256xf32, #tpu.memory_space<vmem>>, vector<8x256xf32>,
    %c0_57 = arith.constant 0 : index
    %c0_58 = arith.constant 0 : index
    %341 = vector.load %arg8[%c0_57, %c0_58] : memref<8x32xf32, #tpu.memory_space<vmem>>, vector<8x32xf32>
    tpu.vector_store %arg8[%c0_57, %c0_58], %338 {strides = array<i32>} : memref<8x32xf32, #tpu.memory_space<vmem>>, vector<8x32xf32>,
    return
  }
}

</mosaic_0001>

<bundles_post_ra>
// kernel: encoder_forward.1
= control target key start
LH: loop header
LB: loop body
LE: loop exit
PB: predicated region body
PF: predicated region fallthrough
CT: control target
= control target key end

     0   :  { %v1695_v2 = vmov 0   ;;  %s2072_s0 = inlined_call_operand.vmem [shape: s32[64,1], index: 0, kind: input, shape index: {}]   ;;  %s2073_s1 = inlined_call_operand.vmem [shape: s32[8,1], index: 1, kind: input, shape index: {}]   ;;  %s2074_s2 = inlined_call_operand.vmem [shape: f32[16,32], index: 2, kind: input, shape index: {}]   ;;  %s2075_s3 = inlined_call_operand.vmem [shape: f32[32,96], index: 3, kind: input, shape index: {}]   ;;  %s2076_s4 = inlined_call_operand.vmem [shape: f32[32,96], index: 4, kind: input, shape index: {}]   ;;  %s2077_s5 = inlined_call_operand.vmem [shape: f32[1,96], index: 5, kind: input, shape index: {}]   ;;  %s2078_s6 = inlined_call_operand.vmem [shape: f32[1,32], index: 6, kind: input, shape index: {}]   ;;  %s2079_s7 = inlined_call_operand.vmem [shape: f32[8,256], index: 7, kind: output, shape index: {0}]   ;;  %s2080_s8 = inlined_call_operand.hbm [shape: f32[8,32], index: 8, kind: output, shape index: {1}]  }
   0x1   :  { %v29_v0 = vld [vmem:[%s2072_s0] sm:$0xff]  ;;  %v31_v1 = vld [vmem:[%s2072_s0 + $0x10] sm:$0xff]  ;;  %1623 = vset.pattern.permute.xlu0 %v1695_v2  ;;  %1624 = vset.pattern.permute.xlu1 %v1695_v2  ;;  %v30_v3 = vld [vmem:[%s2072_s0 + $0x8] sm:$0xff] }
   0x2   :  { %40 = vperm.xlu0 %1623, %v29_v0   ;;  %46 = vperm.xlu1 %1624, %v31_v1   ;;  %v88_v4 = vld [vmem:[%s2074_s2 + $0x8] sm:$0xff]  ;;  %v32_v5 = vld [vmem:[%s2072_s0 + $0x18] sm:$0xff]  ;;  %v87_v6 = vld [vmem:[%s2074_s2] sm:$0xff] }
   0x3   :  { %1492 = vmatprep.subr.mxu0 %v88_v4 }
   0x4   :  { %14 = vsyncpa [#allocation3], 0  ;;  %1493 = vmatpush3.msra.mxu0 %v88_v4  ;;  %v33_v7 = vld [vmem:[%s2072_s0 + $0x20] sm:$0xff]  ;;  %v34_v8 = vld [vmem:[%s2072_s0 + $0x28] sm:$0xff]  ;;  %v1696_v9 = vmov 0.0   ;;  %s1697_s30 = smov 64   ;;  %v37_v15 = vlaneseq }
   0x5   :  { %1494 = vmatprep.subr.mxu0 %v87_v6  ;;  %v35_v10 = vld [vmem:[%s2072_s0 + $0x30] sm:$0xff]  ;;  %v36_v11 = vld [vmem:[%s2072_s0 + $0x38] sm:$0xff]  ;;  %v1406_v12 = vld [vmem:[%s2078_s6] ss:$0 sm:$0xff]  ;;  %vm89_vm0 = vcmask 130048   ;;  %vm1698_vm9 = vmmov 0  }
   0x6   :  { %43 = vperm.xlu0 %1623, %v30_v3   ;;  %49 = vperm.xlu1 %1624, %v32_v5   ;;  %v222_v13 = vld [vmem:[%s2075_s3 + $0x18] sm:$0xff]  ;;  %v221_v14 = vld [vmem:[%s2075_s3 + $0x10] sm:$0xff]  ;;  %v38_v16 = vand.u32 127, %v37_v15  ;;  %v1810_v29 = vld [vmem:[%s2076_s4 + $0x8] sm:$0xff]  ;;  %vm230_vm10 = vcmask 261120   ;;  %s1700_s20 = smov 32  }
   0x7   :  { %1495 = vmatpush3.msra.mxu0 %v87_v6  ;;  %1508 = vmatprep.subr.mxu1 %v222_v13  ;;  %v1794_v23 = vld [vmem:[%s2076_s4 + $0x18] sm:$0xff]  ;;  %v1801_v25 = vld [vmem:[%s2076_s4 + $0x10] sm:$0xff]  ;;  %v1819_v31 = vld [vmem:[%s2076_s4] sm:$0xff]  ;;  %s1701_s22 = smov [#allocation2]  }
   0x8   :  { %1528 = vmatprep.subr.mxu0 %v1696_v9  ;;  %1509 = vmatpush3.msra.mxu1 %v222_v13  ;;  %v220_v37 = vld [vmem:[%s2075_s3 + $0x8] sm:$0xff]  ;;  %v219_v38 = vld [vmem:[%s2075_s3] sm:$0xff]  ;;  %s1371_s23 = sshll.u32 %s1701_s22, 4  ;;  %s1372_s23 = int_to_ptr.vmem [resolvable:$true] %s1371_s23 }
   0x9   :  { %1510 = vmatprep.subr.mxu1 %v221_v14  ;;  %v1871_v48 = vld [vmem:[%s2073_s1] sm:$0xff]  ;;  %s1673_s26 = scalar_lea.vmem %s1372_s23, 128  ;;  %p1678_p1 = scmp.lt.s32.totalorder %s1372_s23, %s1372_s23 }
   0xa   :  { %52 = vperm.xlu0 %1623, %v33_v7   ;;  %55 = vperm.xlu1 %1624, %v34_v8   ;;  %vm371_vm11 = vcmp.gt.s32.totalorder %v1871_v48, 0  ;;  %v1884_v53 = vld [vmem:[%s2077_s5] ss:$0 sm:$0xff]  ;;  %s1699_s5 = smov 96   ;;  %vm374_vm12 = vcmp.gt.s32.totalorder %v1871_v48, 1  ;;  %vm377_vm13 = vcmp.gt.s32.totalorder %v1871_v48, 2  ;;  %p1674_p0 = scmp.ne.s32.totalorder %s1372_s23, %s1673_s26 }
   0xb   :  { %1511 = vmatpush3.msra.mxu1 %v221_v14  ;;  %v1407_v52 = vsel %vm371_vm11, 1.0, %v1696_v9  ;;  %vm380_vm14 = vcmp.gt.s32.totalorder %v1871_v48, 3  ;;  %vm383_vm15 = vcmp.gt.s32.totalorder %v1871_v48, 4  ;;  %p1679_p2 = scmp.lt.s32.totalorder %s1673_s26, %s1673_s26 }
   0xc   :  { %1512 = vmatprep.subr.mxu1 %v220_v37 }
   0xd   :  { %1513 = vmatpush3.msra.mxu1 %v220_v37  ;;  %p1680_p3 = por %p1679_p2, %p1678_p1 }
   0xe   :  { %58 = vperm.xlu0 %1623, %v35_v10   ;;  %61 = vperm.xlu1 %1624, %v36_v11  }
   0xf   :  { %1514 = vmatprep.subr.mxu1 %v219_v38  ;;  %p1681_p4 = pnand %p1680_p3, %p1674_p0 }
  0x10   :  { %1515 = vmatpush3.msra.mxu1 %v219_v38 }
  0x11   :  { %1539 = vmatprep.subr.mxu1 %v1696_v9 }
  0x12   :  { %475 = vrot.lane.b32.xlu0 %v1406_v12, %s1697_s30  ;;  %v504_v12 = vsub.f32 1.0, %v1407_v52 }
  0x7d   :  { %v41_v17 = vpop.permute.xlu0 %40  ;;  %v47_v18 = vpop.permute.xlu1 %46 }
  0x7e   :  { %vm63_vm1 = vcmp.eq.s32.totalorder %v38_v16, %v41_v17  ;;  %vm65_vm2 = vcmp.eq.s32.totalorder %v38_v16, %v47_v18 }
  0x7f   :  { %v1381_v19 = vsel %vm63_vm1, 1.0, %v1696_v9  ;;  %v1383_v22 = vsel %vm65_vm2, 1.0, %v1696_v9  ;;  %vm389_vm1 = vcmp.gt.s32.totalorder %v1871_v48, 6  ;;  %vm392_vm2 = vcmp.gt.s32.totalorder %v1871_v48, 7 }
  0x80   :  { %1496 = vmatprep.mubr.msk.f32.mxu0 %vm89_vm0, %v1381_v19 }
  0x81   :  { %v44_v20 = vpop.permute.xlu0 %43  ;;  %v50_v21 = vpop.permute.xlu1 %49 }
  0x82   :  { %vm64_vm3 = vcmp.eq.s32.totalorder %v38_v16, %v44_v20  ;;  %vm66_vm4 = vcmp.eq.s32.totalorder %v38_v16, %v50_v21 }
  0x83   :  { %v1382_v24 = vsel %vm64_vm3, 1.0, %v1696_v9  ;;  %v1384_v26 = vsel %vm66_vm4, 1.0, %v1696_v9  ;;  %vm1349_vm3 = vcmask 523264   ;;  %vm1351_vm4 = vcmask 785408  }
  0x84   :  { %1497 = vmatmul.mubr.msk.f32.vlgmr.msra.gmra.mxu0 %vm89_vm0, %v1382_v24 }
  0x85   :  { %v53_v27 = vpop.permute.xlu0 %52  ;;  %1499 = vmatprep.mubr.msk.f32.mxu0 %vm89_vm0, %v1383_v22  ;;  %v56_v28 = vpop.permute.xlu1 %55  ;;  %1529 = vmatpush3.msra.mxu0 %v1794_v23 }
  0x86   :  { %vm67_vm5 = vcmp.eq.s32.totalorder %v38_v16, %v53_v27  ;;  %vm68_vm6 = vcmp.eq.s32.totalorder %v38_v16, %v56_v28  ;;  %1530 = vmatprep.subr.mxu0 %v1696_v9 }
  0x87   :  { %v1385_v30 = vsel %vm67_vm5, 1.0, %v1696_v9  ;;  %1531 = vmatpush3.msra.mxu0 %v1801_v25  ;;  %v1386_v32 = vsel %vm68_vm6, 1.0, %v1696_v9 }
  0x88   :  { %1500 = vmatmul.mubr.msk.f32.gmra.mxu0 %vm89_vm0, %v1384_v26  ;;  %1532 = vmatprep.subr.mxu0 %v1696_v9 }
  0x89   :  { %1502 = vmatprep.mubr.msk.f32.mxu0 %vm89_vm0, %v1385_v30  ;;  %v59_v33 = vpop.permute.xlu0 %58  ;;  %v62_v34 = vpop.permute.xlu1 %61  ;;  %1533 = vmatpush3.msra.mxu0 %v1810_v29 }
  0x8a   :  { %vm69_vm7 = vcmp.eq.s32.totalorder %v38_v16, %v59_v33  ;;  %vm70_vm8 = vcmp.eq.s32.totalorder %v38_v16, %v62_v34  ;;  %1534 = vmatprep.subr.mxu0 %v1696_v9 }
  0x8b   :  { %v1387_v35 = vsel %vm69_vm7, 1.0, %v1696_v9  ;;  %1535 = vmatpush3.msra.mxu0 %v1819_v31  ;;  %v1388_v36 = vsel %vm70_vm8, 1.0, %v1696_v9 }
  0x8c   :  { %1503 = vmatmul.mubr.msk.f32.gmra.mxu0 %vm89_vm0, %v1386_v32  ;;  %1550 = vmatprep.subr.mxu0 %v1696_v9 }
  0x8d   :  { %1505 = vmatprep.mubr.msk.f32.mxu0 %vm89_vm0, %v1387_v35  ;;  %v1866_v47 = vpop.permute.xlu0 %475  ;;  %v1408_v35 = vsel %vm374_vm12, 1.0, %v1696_v9 }
  0x90   :  { %1506 = vmatmul.mubr.msk.f32.gmra.mxu0 %vm89_vm0, %v1388_v36  ;;  %vm386_vm0 = vcmp.gt.s32.totalorder %v1871_v48, 5 }
  0x91   :  { %1536 = vmatprep.mubr.msk.f32.mxu0 %vm1698_vm9, %v1696_v9 }
  0x94   :  { %1537 = vmatmul.mubr.f32.vlgmr.msra.gmra.mxu0 %v1696_v9 }
  0x95   :  { %1551 = vmatpush3.msra.mxu0 %v1794_v23  ;;  %1558 = vmatprep.mubr.msk.f32.mxu0 %vm1698_vm9, %v1696_v9 }
  0x96   :  { %1552 = vmatprep.subr.mxu0 %v1696_v9 }
  0x97   :  { %1553 = vmatpush3.msra.mxu0 %v1801_v25 }
  0x98   :  { %1554 = vmatprep.subr.mxu0 %v1696_v9 }
  0x99   :  { %1555 = vmatpush3.msra.mxu0 %v1810_v29 }
  0x9a   :  { %1556 = vmatprep.subr.mxu0 %v1696_v9 }
  0x9b   :  { %1557 = vmatpush3.msra.mxu0 %v1819_v31 }
  0x9c   :  { %1572 = vmatprep.subr.mxu0 %v1696_v9 }
 0x144   :  { %v1498_v39 = vpop.f32.mrf.mxu0 }
 0x146   :  { %v180_v40 = vpop.f32.mrf.mxu0 }
 0x147   :  { %1516 = vmatprep.mubr.msk.f32.mxu1 %vm230_vm10, %v180_v40 }
 0x148   :  { %v1501_v41 = vpop.f32.mrf.mxu0  ;;  %1517 = vmatmul.mubr.msk.f32.vlgmr.msra.gmra.mxu1 %vm230_vm10, %v1498_v39 }
 0x149   :  { %1540 = vmatpush3.msra.mxu1 %v1794_v23 }
 0x14a   :  { %v190_v42 = vpop.f32.mrf.mxu0  ;;  %1541 = vmatprep.subr.mxu1 %v1696_v9 }
 0x14b   :  { %1519 = vmatprep.mubr.msk.f32.mxu1 %vm230_vm10, %v190_v42  ;;  %1542 = vmatpush3.msra.mxu1 %v1801_v25 }
 0x14c   :  { %v1504_v43 = vpop.f32.mrf.mxu0  ;;  %1520 = vmatmul.mubr.msk.f32.gmra.mxu1 %vm230_vm10, %v1501_v41  ;;  %1543 = vmatprep.subr.mxu1 %v1696_v9 }
 0x14d   :  { %1544 = vmatpush3.msra.mxu1 %v1810_v29 }
 0x14e   :  { %v200_v44 = vpop.f32.mrf.mxu0  ;;  %1545 = vmatprep.subr.mxu1 %v1696_v9 }
 0x14f   :  { %1522 = vmatprep.mubr.msk.f32.mxu1 %vm230_vm10, %v200_v44  ;;  %1546 = vmatpush3.msra.mxu1 %v1819_v31 }
 0x150   :  { %v1507_v45 = vpop.f32.mrf.mxu0  ;;  %1523 = vmatmul.mubr.msk.f32.gmra.mxu1 %vm230_vm10, %v1504_v43  ;;  %1561 = vmatprep.subr.mxu1 %v1696_v9  ;;  %v620_v43 = vsub.f32 1.0, %v1408_v35 }
 0x152   :  { %v210_v46 = vpop.f32.mrf.mxu0 }
 0x153   :  { %1525 = vmatprep.mubr.msk.f32.mxu1 %vm230_vm10, %v210_v46 }
 0x154   :  { %v464_v49 = vpop.f32.mrf.mxu0  ;;  %1526 = vmatmul.mubr.msk.f32.gmra.mxu1 %vm230_vm10, %v1507_v45 }
 0x155   :  { %v478_v50 = vadd.f32 %v1866_v47, %v464_v49  ;;  %1547 = vmatprep.mubr.msk.f32.mxu1 %vm1698_vm9, %v1696_v9 }
 0x156   :  { %v1538_v51 = vpop.f32.mrf.mxu0 }
 0x157   :  { %480 = vrot.lane.b32.xlu1 %v478_v50, %s1697_s30 }
 0x15b   :  { %500 = vperm.xlu1 %1624, %v1407_v52  }
 0x1c9   :  { %v481_v10 = vpop.permute.xlu1 %480 }
 0x1d6   :  { %v501_v16 = vpop.permute.xlu1 %500 }
 0x208   :  { %v1518_v54 = vpop.f32.mrf.mxu1 }
 0x209   :  { %v1887_v55 = vadd.f32 %v1518_v54, %v1884_v53 }
 0x20a   :  { %v321_v56 = vpop.f32.mrf.mxu1 }
 0x20b   :  { %v322_v57 = vadd.f32 %v1884_v53, %v321_v56 }
 0x20c   :  { %v1521_v58 = vpop.f32.mrf.mxu1 }
 0x20d   :  { %v468_v59 = vadd.f32 %v464_v49, %v322_v57  ;;  %v1891_v60 = vadd.f32 %v1521_v58, %v1884_v53 }
 0x20e   :  { %v331_v61 = vpop.f32.mrf.mxu1 }
 0x20f   :  { %v1415_v62 = vmul.f32 -1.442695, %v468_v59  ;;  %v1894_v63 = vadd.f32 %v1884_v53, %v331_v61 }
 0x210   :  { %v1524_v0 = vpop.f32.mrf.mxu1 }
 0x211   :  { %1625 = vpow2.f32 %v1415_v62  ;;  %v1897_v1 = vadd.f32 %v1524_v0, %v1884_v53 }
 0x212   :  { %v341_v2 = vpop.f32.mrf.mxu1 }
 0x213   :  { %v1900_v3 = vadd.f32 %v1884_v53, %v341_v2 }
 0x214   :  { %v1527_v4 = vpop.f32.mrf.mxu1 }
 0x215   :  { %v1903_v5 = vadd.f32 %v1527_v4, %v1884_v53  ;;  %v1409_v4 = vsel %vm377_vm13, 1.0, %v1696_v9 }
 0x216   :  { %v1922_v30 = vpop.f32.mrf.mxu1 }
 0x21e   :  { %v1626_v6 = vpop.eup %1625 }
 0x21f   :  { %v472_v7 = vadd.f32 1.0, %v1626_v6 }
 0x221   :  { %1627 = vrcp.f32 %v472_v7 }
 0x22e   :  { %v1628_v8 = vpop.eup %1627 }
 0x22f   :  { %v483_v11 = vmul.f32 %v1628_v8, %v481_v10  ;;  %v490_v17 = vsub.f32 1.0, %v1628_v8  ;;  %v496_v19 = vmul.f32 0.0, %v1628_v8 }
 0x231   :  { %485 = vrot.lane.b32.xlu0 %v483_v11, %s1697_s30 }
 0x235   :  { %507 = vperm.xlu0 %1623, %v504_v12  }
 0x2a3   :  { %v486_v13 = vpop.permute.xlu0 %485 }
 0x2a4   :  { %v488_v14 = vadd.f32 %v486_v13, %v322_v57 }
 0x2a6   :  { %1629 = vtanh.f32 %v488_v14  ;;  %v736_v14 = vsub.f32 1.0, %v1409_v4 }
 0x2b0   :  { %v508_v21 = vpop.permute.xlu0 %507 }
 0x2b1   :  { %v510_v24 = vmul.f32 0.0, %v508_v21 }
 0x2b3   :  { %v1630_v15 = vpop.eup %1629 }
 0x2b4   :  { %492 = vrot.lane.b32.xlu1 %v1630_v15, %s1699_s5 }
 0x326   :  { %v493_v18 = vpop.permute.xlu1 %492 }
 0x327   :  { %v495_v20 = vmul.f32 %v493_v18, %v490_v17 }
 0x329   :  { %v497_v22 = vadd.f32 %v496_v19, %v495_v20 }
 0x32b   :  { %v1907_v26 = vmul.f32 %v501_v16, %v497_v22 }
 0x32d   :  { %v511_v27 = vadd.f32 %v510_v24, %v1907_v26 }
 0x32f   :  { %513 = vrot.lane.b32.xlu0 %v511_v27, %s1699_s5 }
 0x3a1   :  { %v514_v28 = vpop.permute.xlu0 %513 }
 0x3a2   :  { %1548 = vmatmul.mubr.msk.f32.vlgmr.msra.gmra.mxu1 %vm230_vm10, %v514_v28 }
 0x3a3   :  { %1562 = vmatpush3.msra.mxu1 %v1794_v23  ;;  %1569 = vmatprep.mubr.msk.f32.mxu1 %vm1698_vm9, %v1696_v9 }
 0x3a4   :  { %1563 = vmatprep.subr.mxu1 %v1696_v9 }
 0x3a5   :  { %1564 = vmatpush3.msra.mxu1 %v1801_v25 }
 0x3a6   :  { %1565 = vmatprep.subr.mxu1 %v1696_v9 }
 0x3a7   :  { %1566 = vmatpush3.msra.mxu1 %v1810_v29 }
 0x3a8   :  { %1567 = vmatprep.subr.mxu1 %v1696_v9 }
 0x3a9   :  { %1568 = vmatpush3.msra.mxu1 %v1819_v31 }
 0x3aa   :  { %1583 = vmatprep.subr.mxu1 %v1696_v9 }
 0x462   :  { %v583_v32 = vpop.f32.mrf.mxu1 }
 0x463   :  { %v594_v33 = vadd.f32 %v583_v32, %v1866_v47  ;;  %v587_v36 = vadd.f32 %v583_v32, %v1887_v55 }
 0x464   :  { %v1549_v34 = vpop.f32.mrf.mxu1 }
 0x465   :  { %596 = vrot.lane.b32.xlu1 %v594_v33, %s1697_s30  ;;  %v1417_v37 = vmul.f32 -1.442695, %v587_v36 }
 0x467   :  { %1631 = vpow2.f32 %v1417_v37  ;;  %v1410_v37 = vsel %vm380_vm14, 1.0, %v1696_v9 }
 0x469   :  { %616 = vperm.xlu1 %1624, %v1408_v35  }
 0x474   :  { %v1632_v38 = vpop.eup %1631 }
 0x475   :  { %v591_v39 = vadd.f32 1.0, %v1632_v38 }
 0x477   :  { %1633 = vrcp.f32 %v591_v39 }
 0x484   :  { %v1634_v40 = vpop.eup %1633 }
 0x485   :  { %v606_v50 = vsub.f32 1.0, %v1634_v40  ;;  %v612_v52 = vmul.f32 %v1634_v40, %v511_v27 }
 0x4d7   :  { %v597_v41 = vpop.permute.xlu1 %596 }
 0x4d8   :  { %v599_v42 = vmul.f32 %v1634_v40, %v597_v41 }
 0x4da   :  { %601 = vrot.lane.b32.xlu0 %v599_v42, %s1697_s30 }
 0x4de   :  { %623 = vperm.xlu0 %1623, %v620_v43  }
 0x4e4   :  { %v617_v49 = vpop.permute.xlu1 %616 }
 0x54c   :  { %v602_v44 = vpop.permute.xlu0 %601 }
 0x54d   :  { %v604_v45 = vadd.f32 %v602_v44, %v1887_v55 }
 0x54f   :  { %1635 = vtanh.f32 %v604_v45  ;;  %v852_v45 = vsub.f32 1.0, %v1410_v37 }
 0x559   :  { %v624_v56 = vpop.permute.xlu0 %623 }
 0x55a   :  { %v626_v58 = vmul.f32 %v624_v56, %v511_v27 }
 0x55c   :  { %v1636_v46 = vpop.eup %1635 }
 0x55d   :  { %608 = vrot.lane.b32.xlu1 %v1636_v46, %s1699_s5 }
 0x5cf   :  { %v609_v51 = vpop.permute.xlu1 %608 }
 0x5d0   :  { %v611_v54 = vmul.f32 %v609_v51, %v606_v50 }
 0x5d2   :  { %v613_v57 = vadd.f32 %v612_v52, %v611_v54 }
 0x5d4   :  { %v1932_v59 = vmul.f32 %v617_v49, %v613_v57 }
 0x5d6   :  { %v627_v61 = vadd.f32 %v626_v58, %v1932_v59 }
 0x5d8   :  { %629 = vrot.lane.b32.xlu0 %v627_v61, %s1699_s5 }
 0x64a   :  { %v630_v62 = vpop.permute.xlu0 %629 }
 0x64b   :  { %1559 = vmatmul.mubr.msk.f32.vlgmr.msra.gmra.mxu0 %vm230_vm10, %v630_v62 }
 0x64c   :  { %1573 = vmatpush3.msra.mxu0 %v1794_v23  ;;  %1580 = vmatprep.mubr.msk.f32.mxu0 %vm1698_vm9, %v1696_v9 }
 0x64d   :  { %1574 = vmatprep.subr.mxu0 %v1696_v9 }
 0x64e   :  { %1575 = vmatpush3.msra.mxu0 %v1801_v25 }
 0x64f   :  { %1576 = vmatprep.subr.mxu0 %v1696_v9 }
 0x650   :  { %1577 = vmatpush3.msra.mxu0 %v1810_v29 }
 0x651   :  { %1578 = vmatprep.subr.mxu0 %v1696_v9 }
 0x652   :  { %1579 = vmatpush3.msra.mxu0 %v1819_v31 }
 0x653   :  { %1594 = vmatprep.subr.mxu0 %v1696_v9 }
 0x70b   :  { %v699_v55 = vpop.f32.mrf.mxu0 }
 0x70c   :  { %v710_v0 = vadd.f32 %v699_v55, %v1866_v47  ;;  %v703_v6 = vadd.f32 %v699_v55, %v1894_v63 }
 0x70d   :  { %v1560_v2 = vpop.f32.mrf.mxu0 }
 0x70e   :  { %712 = vrot.lane.b32.xlu1 %v710_v0, %s1697_s30  ;;  %v1419_v7 = vmul.f32 -1.442695, %v703_v6 }
 0x710   :  { %1637 = vpow2.f32 %v1419_v7  ;;  %v1411_v7 = vsel %vm383_vm15, 1.0, %v1696_v9 }
 0x712   :  { %732 = vperm.xlu1 %1624, %v1409_v4  }
 0x71d   :  { %v1638_v8 = vpop.eup %1637 }
 0x71e   :  { %v707_v10 = vadd.f32 1.0, %v1638_v8 }
 0x720   :  { %1639 = vrcp.f32 %v707_v10 }
 0x72d   :  { %v1640_v11 = vpop.eup %1639 }
 0x72e   :  { %v722_v19 = vsub.f32 1.0, %v1640_v11  ;;  %v728_v21 = vmul.f32 %v1640_v11, %v627_v61 }
 0x780   :  { %v713_v12 = vpop.permute.xlu1 %712 }
 0x781   :  { %v715_v13 = vmul.f32 %v1640_v11, %v713_v12 }
 0x783   :  { %717 = vrot.lane.b32.xlu0 %v715_v13, %s1697_s30 }
 0x787   :  { %739 = vperm.xlu0 %1623, %v736_v14  }
 0x78d   :  { %v733_v18 = vpop.permute.xlu1 %732 }
 0x7f5   :  { %v718_v15 = vpop.permute.xlu0 %717 }
 0x7f6   :  { %v720_v16 = vadd.f32 %v718_v15, %v1894_v63 }
 0x7f8   :  { %1641 = vtanh.f32 %v720_v16  ;;  %v968_v16 = vsub.f32 1.0, %v1411_v7 }
 0x802   :  { %v740_v24 = vpop.permute.xlu0 %739 }
 0x803   :  { %v742_v28 = vmul.f32 %v740_v24, %v627_v61 }
 0x805   :  { %v1642_v17 = vpop.eup %1641 }
 0x806   :  { %724 = vrot.lane.b32.xlu1 %v1642_v17, %s1699_s5 }
 0x878   :  { %v725_v20 = vpop.permute.xlu1 %724 }
 0x879   :  { %v727_v22 = vmul.f32 %v725_v20, %v722_v19 }
 0x87b   :  { %v729_v27 = vadd.f32 %v728_v21, %v727_v22 }
 0x87d   :  { %v1955_v32 = vmul.f32 %v733_v18, %v729_v27 }
 0x87f   :  { %v743_v33 = vadd.f32 %v742_v28, %v1955_v32 }
 0x881   :  { %745 = vrot.lane.b32.xlu0 %v743_v33, %s1699_s5 }
 0x8f3   :  { %v746_v34 = vpop.permute.xlu0 %745 }
 0x8f4   :  { %1570 = vmatmul.mubr.msk.f32.vlgmr.msra.gmra.mxu1 %vm230_vm10, %v746_v34 }
 0x8f5   :  { %1584 = vmatpush3.msra.mxu1 %v1794_v23  ;;  %1591 = vmatprep.mubr.msk.f32.mxu1 %vm1698_vm9, %v1696_v9 }
 0x8f6   :  { %1585 = vmatprep.subr.mxu1 %v1696_v9 }
 0x8f7   :  { %1586 = vmatpush3.msra.mxu1 %v1801_v25 }
 0x8f8   :  { %1587 = vmatprep.subr.mxu1 %v1696_v9 }
 0x8f9   :  { %1588 = vmatpush3.msra.mxu1 %v1810_v29 }
 0x8fa   :  { %1589 = vmatprep.subr.mxu1 %v1696_v9 }
 0x8fb   :  { %1590 = vmatpush3.msra.mxu1 %v1819_v31 }
 0x8fc   :  { %1605 = vmatprep.subr.mxu1 %v1696_v9 }
 0x9b4   :  { %v815_v63 = vpop.f32.mrf.mxu1 }
 0x9b5   :  { %v826_v35 = vadd.f32 %v815_v63, %v1866_v47  ;;  %v819_v38 = vadd.f32 %v815_v63, %v1891_v60 }
 0x9b6   :  { %v1571_v36 = vpop.f32.mrf.mxu1 }
 0x9b7   :  { %828 = vrot.lane.b32.xlu1 %v826_v35, %s1697_s30  ;;  %v1421_v39 = vmul.f32 -1.442695, %v819_v38  ;;  %v1412_v38 = vsel %vm386_vm0, 1.0, %v1696_v9 }
 0x9b9   :  { %1643 = vpow2.f32 %v1421_v39 }
 0x9bb   :  { %848 = vperm.xlu1 %1624, %v1410_v37  }
 0x9c6   :  { %v1644_v40 = vpop.eup %1643 }
 0x9c7   :  { %v823_v41 = vadd.f32 1.0, %v1644_v40 }
 0x9c9   :  { %1645 = vrcp.f32 %v823_v41 }
 0x9d6   :  { %v1646_v42 = vpop.eup %1645 }
 0x9d7   :  { %v838_v52 = vsub.f32 1.0, %v1646_v42  ;;  %v844_v56 = vmul.f32 %v1646_v42, %v743_v33 }
 0xa29   :  { %v829_v43 = vpop.permute.xlu1 %828 }
 0xa2a   :  { %v831_v44 = vmul.f32 %v1646_v42, %v829_v43  ;;  %v1084_v43 = vsub.f32 1.0, %v1412_v38 }
 0xa2c   :  { %833 = vrot.lane.b32.xlu0 %v831_v44, %s1697_s30 }
 0xa30   :  { %855 = vperm.xlu0 %1623, %v852_v45  }
 0xa36   :  { %v849_v51 = vpop.permute.xlu1 %848 }
 0xa9e   :  { %v834_v46 = vpop.permute.xlu0 %833 }
 0xa9f   :  { %v836_v49 = vadd.f32 %v834_v46, %v1891_v60 }
 0xaa1   :  { %1647 = vtanh.f32 %v836_v49 }
 0xaab   :  { %v856_v58 = vpop.permute.xlu0 %855 }
 0xaac   :  { %v858_v62 = vmul.f32 %v856_v58, %v743_v33 }
 0xaae   :  { %v1648_v50 = vpop.eup %1647 }
 0xaaf   :  { %840 = vrot.lane.b32.xlu1 %v1648_v50, %s1699_s5 }
 0xb21   :  { %v841_v54 = vpop.permute.xlu1 %840 }
 0xb22   :  { %v843_v57 = vmul.f32 %v841_v54, %v838_v52 }
 0xb24   :  { %v845_v61 = vadd.f32 %v844_v56, %v843_v57 }
 0xb26   :  { %v1978_v55 = vmul.f32 %v849_v51, %v845_v61 }
 0xb28   :  { %v859_v0 = vadd.f32 %v858_v62, %v1978_v55 }
 0xb2a   :  { %861 = vrot.lane.b32.xlu0 %v859_v0, %s1699_s5 }
 0xb9c   :  { %v862_v2 = vpop.permute.xlu0 %861 }
 0xb9d   :  { %1581 = vmatmul.mubr.msk.f32.vlgmr.msra.gmra.mxu0 %vm230_vm10, %v862_v2 }
 0xb9e   :  { %1595 = vmatpush3.msra.mxu0 %v1794_v23  ;;  %1602 = vmatprep.mubr.msk.f32.mxu0 %vm1698_vm9, %v1696_v9 }
 0xb9f   :  { %1596 = vmatprep.subr.mxu0 %v1696_v9 }
 0xba0   :  { %1597 = vmatpush3.msra.mxu0 %v1801_v25 }
 0xba1   :  { %1598 = vmatprep.subr.mxu0 %v1696_v9 }
 0xba2   :  { %1599 = vmatpush3.msra.mxu0 %v1810_v29 }
 0xba3   :  { %1600 = vmatprep.subr.mxu0 %v1696_v9 }
 0xba4   :  { %1601 = vmatpush3.msra.mxu0 %v1819_v31 }
 0xc5d   :  { %v931_v60 = vpop.f32.mrf.mxu0 }
 0xc5e   :  { %v942_v4 = vadd.f32 %v931_v60, %v1866_v47  ;;  %v935_v8 = vadd.f32 %v931_v60, %v1900_v3 }
 0xc5f   :  { %v1582_v6 = vpop.f32.mrf.mxu0 }
 0xc60   :  { %944 = vrot.lane.b32.xlu1 %v942_v4, %s1697_s30  ;;  %v1423_v10 = vmul.f32 -1.442695, %v935_v8  ;;  %v1413_v4 = vsel %vm389_vm1, 1.0, %v1696_v9  ;;  %v352_v6 = vadd.f32 %v1884_v53, %v1922_v30 }
 0xc62   :  { %1649 = vpow2.f32 %v1423_v10 }
 0xc64   :  { %964 = vperm.xlu1 %1624, %v1411_v7  }
 0xc6f   :  { %v1650_v11 = vpop.eup %1649 }
 0xc70   :  { %v939_v12 = vadd.f32 1.0, %v1650_v11 }
 0xc72   :  { %1651 = vrcp.f32 %v939_v12 }
 0xc7f   :  { %v1652_v13 = vpop.eup %1651 }
 0xc80   :  { %v954_v21 = vsub.f32 1.0, %v1652_v13  ;;  %v960_v24 = vmul.f32 %v1652_v13, %v859_v0 }
 0xcd2   :  { %v945_v14 = vpop.permute.xlu1 %944 }
 0xcd3   :  { %v947_v15 = vmul.f32 %v1652_v13, %v945_v14 }
 0xcd5   :  { %949 = vrot.lane.b32.xlu0 %v947_v15, %s1697_s30  ;;  %v1200_v15 = vsub.f32 1.0, %v1413_v4 }
 0xcd9   :  { %971 = vperm.xlu0 %1623, %v968_v16  }
 0xcdf   :  { %v965_v20 = vpop.permute.xlu1 %964 }
 0xd47   :  { %v950_v17 = vpop.permute.xlu0 %949 }
 0xd48   :  { %v952_v18 = vadd.f32 %v950_v17, %v1900_v3 }
 0xd4a   :  { %1653 = vtanh.f32 %v952_v18 }
 0xd54   :  { %v972_v28 = vpop.permute.xlu0 %971 }
 0xd55   :  { %v974_v34 = vmul.f32 %v972_v28, %v859_v0 }
 0xd57   :  { %v1654_v19 = vpop.eup %1653 }
 0xd58   :  { %956 = vrot.lane.b32.xlu1 %v1654_v19, %s1699_s5 }
 0xdca   :  { %v957_v22 = vpop.permute.xlu1 %956 }
 0xdcb   :  { %v959_v27 = vmul.f32 %v957_v22, %v954_v21 }
 0xdcd   :  { %v961_v33 = vadd.f32 %v960_v24, %v959_v27 }
 0xdcf   :  { %v2000_v63 = vmul.f32 %v965_v20, %v961_v33 }
 0xdd1   :  { %v975_v35 = vadd.f32 %v974_v34, %v2000_v63 }
 0xdd3   :  { %977 = vrot.lane.b32.xlu0 %v975_v35, %s1699_s5 }
 0xe45   :  { %v978_v36 = vpop.permute.xlu0 %977 }
 0xe46   :  { %1592 = vmatmul.mubr.msk.f32.vlgmr.msra.gmra.mxu1 %vm230_vm10, %v978_v36 }
 0xe47   :  { %1606 = vmatpush3.msra.mxu1 %v1794_v23  ;;  %1613 = vmatprep.mubr.msk.f32.mxu1 %vm1698_vm9, %v1696_v9 }
 0xe48   :  { %1607 = vmatprep.subr.mxu1 %v1696_v9 }
 0xe49   :  { %1608 = vmatpush3.msra.mxu1 %v1801_v25 }
 0xe4a   :  { %1609 = vmatprep.subr.mxu1 %v1696_v9 }
 0xe4b   :  { %1610 = vmatpush3.msra.mxu1 %v1810_v29 }
 0xe4c   :  { %1611 = vmatprep.subr.mxu1 %v1696_v9 }
 0xe4d   :  { %1612 = vmatpush3.msra.mxu1 %v1819_v31 }
 0xf06   :  { %v1047_v3 = vpop.f32.mrf.mxu1 }
 0xf07   :  { %v1058_v37 = vadd.f32 %v1047_v3, %v1866_v47  ;;  %v1051_v25 = vadd.f32 %v1047_v3, %v1897_v1 }
 0xf08   :  { %v1593_v23 = vpop.f32.mrf.mxu1 }
 0xf09   :  { %1060 = vrot.lane.b32.xlu1 %v1058_v37, %s1697_s30  ;;  %v1425_v39 = vmul.f32 -1.442695, %v1051_v25  ;;  %v1414_v37 = vsel %vm392_vm2, 1.0, %v1696_v9 }
 0xf0b   :  { %1655 = vpow2.f32 %v1425_v39 }
 0xf0d   :  { %1080 = vperm.xlu1 %1624, %v1412_v38  }
 0xf18   :  { %v1656_v29 = vpop.eup %1655 }
 0xf19   :  { %v1055_v40 = vadd.f32 1.0, %v1656_v29 }
 0xf1b   :  { %1657 = vrcp.f32 %v1055_v40 }
 0xf28   :  { %v1658_v41 = vpop.eup %1657 }
 0xf29   :  { %v1070_v50 = vsub.f32 1.0, %v1658_v41  ;;  %v1076_v52 = vmul.f32 %v1658_v41, %v975_v35 }
 0xf7b   :  { %v1061_v31 = vpop.permute.xlu1 %1060 }
 0xf7c   :  { %v1063_v42 = vmul.f32 %v1658_v41, %v1061_v31  ;;  %v1316_v31 = vsub.f32 1.0, %v1414_v37 }
 0xf7e   :  { %1065 = vrot.lane.b32.xlu0 %v1063_v42, %s1697_s30 }
 0xf82   :  { %1087 = vperm.xlu0 %1623, %v1084_v43  }
 0xf88   :  { %v1081_v49 = vpop.permute.xlu1 %1080 }
 0xff0   :  { %v1066_v44 = vpop.permute.xlu0 %1065 }
 0xff1   :  { %v1068_v45 = vadd.f32 %v1066_v44, %v1897_v1 }
 0xff3   :  { %1659 = vtanh.f32 %v1068_v45 }
 0xffd   :  { %v1088_v56 = vpop.permute.xlu0 %1087 }
 0xffe   :  { %v1090_v58 = vmul.f32 %v1088_v56, %v975_v35 }
0x1000   :  { %v1660_v46 = vpop.eup %1659 }
0x1001   :  { %1072 = vrot.lane.b32.xlu1 %v1660_v46, %s1699_s5 }
0x1073   :  { %v1073_v51 = vpop.permute.xlu1 %1072 }
0x1074   :  { %v1075_v54 = vmul.f32 %v1073_v51, %v1070_v50 }
0x1076   :  { %v1077_v57 = vadd.f32 %v1076_v52, %v1075_v54 }
0x1078   :  { %v2022_v61 = vmul.f32 %v1081_v49, %v1077_v57 }
0x107a   :  { %v1091_v62 = vadd.f32 %v1090_v58, %v2022_v61 }
0x107c   :  { %1093 = vrot.lane.b32.xlu0 %v1091_v62, %s1699_s5 }
0x10ee   :  { %v1094_v0 = vpop.permute.xlu0 %1093 }
0x10ef   :  { %1603 = vmatmul.mubr.msk.f32.vlgmr.msra.gmra.mxu0 %vm230_vm10, %v1094_v0 }
0x11af   :  { %v1163_v1 = vpop.f32.mrf.mxu0 }
0x11b0   :  { %v1174_v2 = vadd.f32 %v1163_v1, %v1866_v47  ;;  %v1167_v7 = vadd.f32 %v1163_v1, %v352_v6 }
0x11b1   :  { %v1604_v60 = vpop.f32.mrf.mxu0 }
0x11b2   :  { %1176 = vrot.lane.b32.xlu1 %v1174_v2, %s1697_s30  ;;  %v1427_v8 = vmul.f32 -1.442695, %v1167_v7 }
0x11b4   :  { %1661 = vpow2.f32 %v1427_v8 }
0x11b6   :  { %1196 = vperm.xlu1 %1624, %v1413_v4  }
0x11c1   :  { %v1662_v10 = vpop.eup %1661 }
0x11c2   :  { %v1171_v11 = vadd.f32 1.0, %v1662_v10 }
0x11c4   :  { %1663 = vrcp.f32 %v1171_v11 }
0x11d1   :  { %v1664_v12 = vpop.eup %1663 }
0x11d2   :  { %v1186_v30 = vsub.f32 1.0, %v1664_v12  ;;  %v1192_v20 = vmul.f32 %v1664_v12, %v1091_v62 }
0x1224   :  { %v1177_v13 = vpop.permute.xlu1 %1176 }
0x1225   :  { %v1179_v14 = vmul.f32 %v1664_v12, %v1177_v13 }
0x1227   :  { %1181 = vrot.lane.b32.xlu0 %v1179_v14, %s1697_s30 }
0x122b   :  { %1203 = vperm.xlu0 %1623, %v1200_v15  }
0x1231   :  { %v1197_v53 = vpop.permute.xlu1 %1196 }
0x1299   :  { %v1182_v16 = vpop.permute.xlu0 %1181 }
0x129a   :  { %v1184_v17 = vadd.f32 %v1182_v16, %v352_v6 }
0x129c   :  { %1665 = vtanh.f32 %v1184_v17 }
0x12a6   :  { %v1204_v22 = vpop.permute.xlu0 %1203 }
0x12a7   :  { %v1206_v27 = vmul.f32 %v1204_v22, %v1091_v62 }
0x12a9   :  { %v1666_v18 = vpop.eup %1665 }
0x12aa   :  { %1188 = vrot.lane.b32.xlu1 %v1666_v18, %s1699_s5 }
0x131c   :  { %v1189_v19 = vpop.permute.xlu1 %1188 }
0x131d   :  { %v1191_v21 = vmul.f32 %v1189_v19, %v1186_v30 }
0x131f   :  { %v1193_v24 = vadd.f32 %v1192_v20, %v1191_v21 }
0x1321   :  { %v1199_v28 = vmul.f32 %v1197_v53, %v1193_v24 }
0x1323   :  { %v1207_v33 = vadd.f32 %v1206_v27, %v1199_v28 }
0x1325   :  { %1209 = vrot.lane.b32.xlu0 %v1207_v33, %s1699_s5 }
0x1397   :  { %v1210_v34 = vpop.permute.xlu0 %1209 }
0x1398   :  { %1614 = vmatmul.mubr.msk.f32.vlgmr.msra.gmra.mxu1 %vm230_vm10, %v1210_v34 }
0x1458   :  { %v1279_v35 = vpop.f32.mrf.mxu1 }
0x1459   :  { %v1290_v36 = vadd.f32 %v1279_v35, %v1866_v47  ;;  %v1283_v23 = vadd.f32 %v1279_v35, %v1903_v5 }
0x145a   :  { %v1615_v3 = vpop.f32.mrf.mxu1 }
0x145b   :  { %1292 = vrot.lane.b32.xlu1 %v1290_v36, %s1697_s30  ;;  %v1429_v38 = vmul.f32 -1.442695, %v1283_v23 }
0x145d   :  { %1667 = vpow2.f32 %v1429_v38 }
0x145f   :  { %1312 = vperm.xlu1 %1624, %v1414_v37  }
0x146a   :  { %v1668_v25 = vpop.eup %1667 }
0x146b   :  { %v1287_v39 = vadd.f32 1.0, %v1668_v25 }
0x146d   :  { %1669 = vrcp.f32 %v1287_v39 }
0x147a   :  { %v1670_v29 = vpop.eup %1669 }
0x147b   :  { %v1302_v46 = vsub.f32 1.0, %v1670_v29 }
0x14cd   :  { %v1293_v40 = vpop.permute.xlu1 %1292 }
0x14ce   :  { %v1295_v41 = vmul.f32 %v1670_v29, %v1293_v40 }
0x14d0   :  { %1297 = vrot.lane.b32.xlu0 %v1295_v41, %s1697_s30 }
0x14d4   :  { %1319 = vperm.xlu0 %1623, %v1316_v31  }
0x14d8   :  { %1325 = vrot.lane.b32.xlu0 %v1907_v26, %s1699_s5 }
0x14da   :  { %v1313_v45 = vpop.permute.xlu1 %1312 }
0x14dc   :  { %1329 = vrot.lane.b32.xlu0 %v1955_v32, %s1700_s20 }
0x14e0   :  { %1333 = vrot.lane.b32.xlu0 %v1978_v55, %s1697_s30 }
0x1542   :  { %v1298_v9 = vpop.permute.xlu0 %1297 }
0x1543   :  { %v1300_v47 = vadd.f32 %v1298_v9, %v1903_v5 }
0x1545   :  { %1671 = vtanh.f32 %v1300_v47 }
0x154f   :  { %v1320_v48 = vpop.permute.xlu0 %1319 }
0x1550   :  { %v1322_v52 = vmul.f32 %v1320_v48, %v1207_v33 }
0x1552   :  { %v1672_v42 = vpop.eup %1671 }
0x1553   :  { %1304 = vrot.lane.b32.xlu1 %v1672_v42, %s1699_s5  ;;  %v1326_v43 = vpop.permute.xlu0 %1325 }
0x1554   :  { %v1348_v26 = vsel %vm230_vm10, %v1326_v43, %v1932_v59 }
0x1557   :  { %1337 = vrot.lane.b32.xlu1 %v2000_v63, %s1699_s5  ;;  %v1330_v44 = vpop.permute.xlu0 %1329  ;;  %v1308_v63 = vmul.f32 %v1670_v29, %v1207_v33 }
0x1558   :  { %v1350_v32 = vsel %vm1349_vm3, %v1348_v26, %v1330_v44 }
0x155b   :  { %1341 = vrot.lane.b32.xlu1 %v1199_v28, %s1700_s20  ;;  %v1334_v55 = vpop.permute.xlu0 %1333 }
0x155c   :  { %v1352_v5 = vsel %vm1351_vm4, %v1350_v32, %v1334_v55 }
0x155d   :  { %1356 = vst [vmem:[%s2079_s7] sm:$0xff] %v1352_v5 }
0x15c5   :  { %v1305_v49 = vpop.permute.xlu1 %1304 }
0x15c6   :  { %v1307_v50 = vmul.f32 %v1305_v49, %v1302_v46 }
0x15c8   :  { %v1309_v51 = vadd.f32 %v1308_v63, %v1307_v50 }
0x15c9   :  { %v1338_v56 = vpop.permute.xlu1 %1337 }
0x15ca   :  { %v1315_v54 = vmul.f32 %v1313_v45, %v1309_v51  ;;  %v1353_v58 = vsel %vm230_vm10, %v1338_v56, %v2022_v61 }
0x15cc   :  { %1345 = vrot.lane.b32.xlu1 %v1315_v54, %s1697_s30  ;;  %v1323_v59 = vadd.f32 %v1322_v52, %v1315_v54 }
0x15cd   :  { %v1342_v57 = vpop.permute.xlu1 %1341 }
0x15ce   :  { %1359 = vrot.lane.b32.xlu0 %v1323_v59, %s1699_s5  ;;  %v1354_v62 = vsel %vm1349_vm3, %v1353_v58, %v1342_v57 }
0x163e   :  { %v1346_v0 = vpop.permute.xlu1 %1345 }
0x163f   :  { %v1355_v1 = vsel %vm1351_vm4, %v1354_v62, %v1346_v0 }
0x1640   :  { %1357 = vst [vmem:[%s2079_s7 + $0x8] sm:$0xff] %v1355_v1  ;;  %v1360_v2 = vpop.permute.xlu0 %1359 }
0x1641   :  { %1362 = vst.msk [vmem:[#allocation2] sm:$0xff] %vm230_vm10, %v1360_v2 }
0x1642   :  { %1684 = shalt.err (!%p1681_p4)
}
0x1643   :  { %1374 = dma.vmem_to_hbm [thread:$0]  %s1372_s23, 128, %s2080_s8, [#allocation3]  }
0x1644   :  { %1693 = dma.done.wait [#allocation3], 128  }
0x1645   :  { %1694 = vsyncadd [#allocation3], 4294967168 }
0x1646   :  { %1380 = vsyncpa [#allocation3], 1 }

</bundles_post_ra>
